<compile_context>
chip_gen: v7x
topology: tpu7x:2x2x1
jax: 0.10.0
libtpu: 0.0.40
codegen_flags: <defaults>
</compile_context>

<pallas_src>
import functools

import jax
import jax.numpy as jnp
from jax import lax
from jax.experimental import pallas as pl
from jax.experimental.pallas import tpu as pltpu


def _round_up(x, m):
    return (x + m - 1) // m * m


def _cdiv(a, b):
    return -(-a // b)


def _sublane_mult(dtype):
    # Required second-minor multiple for a partial block of this dtype.
    return max(8, 32 // jnp.dtype(dtype).itemsize)


def _iou_counts_kernel(yhat_ref, y_ref, out_ref, *, num_rows, tiles_per_chunk,
                       needs_mask):
    # yhat_ref: (C, TILE_H, W) native dtype   y_ref: (TILE_H, W) int
    # out_ref:  (4, W) f32 accumulator rows = [inter1, union1, inter2, union2]
    C, tile_h, W = yhat_ref.shape
    f32 = jnp.float32

    x0 = yhat_ref[0].astype(f32)
    x1 = yhat_ref[1].astype(f32)
    x2 = yhat_ref[2].astype(f32)

    # pred1 <=> argmax(channels) == 1 (strict '>' before, '>=' after: first max wins)
    after1 = x2
    for c in range(3, C):
        after1 = jnp.maximum(after1, yhat_ref[c].astype(f32))
    pred1 = jnp.logical_and(x1 > x0, x1 >= after1)

    # pred2 <=> argmax(channels) == 2
    pred2 = x2 > jnp.maximum(x0, x1)
    if C > 3:
        after2 = yhat_ref[3].astype(f32)
        for c in range(4, C):
            after2 = jnp.maximum(after2, yhat_ref[c].astype(f32))
        pred2 = jnp.logical_and(pred2, x2 >= after2)

    yv = y_ref[...].astype(jnp.int32)
    y1 = yv == 1
    y2 = yv == 2

    if needs_mask:
        # Tail tile(s) overhang H: gate predictions AND labels so out-of-range
        # (unspecified) rows contribute nothing.
        p = pl.program_id(1)
        h = pl.program_id(2)
        start = (p * tiles_per_chunk + h) * tile_h
        rows = lax.broadcasted_iota(jnp.int32, (tile_h, W), 0) + start
        valid = rows < num_rows
        pred1 = jnp.logical_and(pred1, valid)
        pred2 = jnp.logical_and(pred2, valid)
        y1 = jnp.logical_and(y1, valid)
        y2 = jnp.logical_and(y2, valid)

    # Stage 1 of the reduction: sublane (row) sums -> per-lane partial counts.
    i1 = jnp.sum(jnp.logical_and(pred1, y1).astype(f32), axis=0, keepdims=True)
    u1 = jnp.sum(jnp.logical_or(pred1, y1).astype(f32), axis=0, keepdims=True)
    i2 = jnp.sum(jnp.logical_and(pred2, y2).astype(f32), axis=0, keepdims=True)
    u2 = jnp.sum(jnp.logical_or(pred2, y2).astype(f32), axis=0, keepdims=True)
    partial = jnp.concatenate([i1, u1, i2, u2], axis=0)  # (4, W)

    @pl.when(pl.program_id(2) == 0)
    def _init():
        out_ref[...] = jnp.zeros_like(out_ref)

    out_ref[...] += partial  # single fused RMW per tile


@functools.partial(jax.jit, static_argnames=("eps",))
def iou_pallas(yhat, y, eps=1e-07):
    """yhat: (N, C, H, W) float logits (C >= 3); y: (N, H, W) or (N, 1, H, W) int labels in {0,1,2}."""
    if y.ndim == 4:  # mirror the reference's y.squeeze(1)
        y = y[:, 0]
    if jnp.issubdtype(y.dtype, jnp.floating):
        y = y.astype(jnp.int32)
    N, C, H, W = yhat.shape
    assert C >= 3, "need at least 3 logit channels (classes 0, 1, 2)"

    mult = max(_sublane_mult(yhat.dtype), _sublane_mult(y.dtype))
    bytes_per_row = W * (C * yhat.dtype.itemsize + y.dtype.itemsize)
    budget_rows = max(mult, ((12 << 20) // bytes_per_row) // mult * mult)

    h_ceil = _round_up(H, mult)
    if budget_rows >= h_ceil:
        # Whole image fits in one step; prefer splitting in two so the P axis
        # gives both v7x TensorCores work even when N == 1.
        half = _round_up(_cdiv(H, 2), mult)
        tile_h = half if half < H else H
    else:
        tile_h = budget_rows

    total_tiles = _cdiv(H, tile_h)
    P = 2 if total_tiles >= 2 else 1
    tiles_per_chunk = _cdiv(total_tiles, P)
    needs_mask = (P * tiles_per_chunk * tile_h != H)
    clamp = (P * tiles_per_chunk != total_tiles)

    def tile_idx(p, h):
        t = p * tiles_per_chunk + h
        if clamp:
            # Last chunk may have a spare step: re-read the last valid tile
            # (its contribution is masked to zero in-kernel).
            t = jnp.minimum(t, total_tiles - 1)
        return t

    kernel = functools.partial(
        _iou_counts_kernel, num_rows=H, tiles_per_chunk=tiles_per_chunk,
        needs_mask=needs_mask)

    counts = pl.pallas_call(
        kernel,
        out_shape=jax.ShapeDtypeStruct((N, P, 4, W), jnp.float32),
        grid_spec=pltpu.PrefetchScalarGridSpec(
            num_scalar_prefetch=0,
            grid=(N, P, tiles_per_chunk),
            in_specs=[
                pl.BlockSpec((None, C, tile_h, W),
                             lambda n, p, h: (n, 0, tile_idx(p, h), 0)),
                pl.BlockSpec((None, tile_h, W),
                             lambda n, p, h: (n, tile_idx(p, h), 0)),
            ],
            out_specs=pl.BlockSpec((None, None, 4, W),
                                   lambda n, p, h: (n, p, 0, 0)),
        ),
        compiler_params=pltpu.CompilerParams(
            dimension_semantics=("parallel", "parallel", "arbitrary"),
            vmem_limit_bytes=48 * 1024 * 1024,
        ),
    )(yhat, y)

    # Stage 2: tiny final reduction + division on the XLA side.
    totals = jnp.sum(counts, axis=(0, 1, 3))  # [inter1, union1, inter2, union2]
    iou1 = totals[0] / (totals[1] + eps)
    iou2 = totals[2] / (totals[3] + eps)
    # Class-0 prediction channel is identically zero in the reference, so its
    # IoU term is exactly 0; the mean still divides by 3 classes.
    return (iou1 + iou2) / jnp.float32(3.0)


def _reference_iou(yhat, y, eps=1e-07):
    """Pure-JAX mirror of the PyTorch module's forward."""
    if y.ndim == 4:
        y = y[:, 0]
    y = y.astype(jnp.int32)
    yhat = yhat.astype(jnp.float32)
    N, C, H, W = yhat.shape
    pred = jnp.argmax(jax.nn.softmax(yhat, axis=1), axis=1)
    probas = jnp.zeros((N, 3, H, W), jnp.float32)
    probas = probas.at[:, 1].set((pred == 1).astype(jnp.float32))
    probas = probas.at[:, 2].set((pred == 2).astype(jnp.float32))
    true_1_hot = jax.nn.one_hot(y, 3, dtype=jnp.float32)      # (N, H, W, 3)
    true_1_hot = jnp.transpose(true_1_hot, (0, 3, 1, 2))      # (N, 3, H, W)
    dims = (0, 2, 3)
    intersection = jnp.sum(probas * true_1_hot, axis=dims)
    cardinality = jnp.sum(probas + true_1_hot, axis=dims)
    union = cardinality - intersection
    return jnp.mean(intersection / (union + eps))


if __name__ == "__main__":
    k1, k2, k3, k4, k5, k6 = jax.random.split(jax.random.PRNGKey(0), 6)

    # Case 1: f32 logits, (N, 1, H, W) int32 labels.
    yhat1 = jax.random.normal(k1, (2, 3, 16, 16), dtype=jnp.float32)
    y1 = jax.random.randint(k2, (2, 1, 16, 16), 0, 3, dtype=jnp.int32)

    # Case 2: C=4, ragged H (exercises in-kernel tail masking + P split, N=1).
    yhat2 = jax.random.normal(k3, (1, 4, 24, 16), dtype=jnp.float32)
    y2 = jax.random.randint(k4, (1, 24, 16), 0, 3, dtype=jnp.int32)

    # Case 3: bf16 logits + int8 labels (native-dtype HBM traffic path).
    yhat3 = jax.random.normal(k5, (1, 3, 64, 16), dtype=jnp.float32).astype(jnp.bfloat16)
    y3 = jax.random.randint(k6, (1, 64, 16), 0, 3, dtype=jnp.int32).astype(jnp.int8)

    for yh, yy in [(yhat1, y1), (yhat2, y2), (yhat3, y3)]:
        out = iou_pallas(yh, yy, eps=1e-07)
        jax.block_until_ready(out)
        ref = _reference_iou(yh, yy, eps=1e-07)
        assert jnp.allclose(out, ref, atol=1e-6, rtol=1e-6), (yh.shape, out, ref)

    print("KERNEL_OK")
</pallas_src>

<mosaic_0001>
module attributes {stable_mosaic.version = 11 : i64} {
  func.func @_iou_counts_kernel(%arg0: i32, %arg1: i32, %arg2: i32, %arg3: memref<1x3x8x16xf32, #tpu.memory_space<vmem>>, %arg4: memref<1x8x16xi32, #tpu.memory_space<vmem>>, %arg5: memref<1x1x4x16xf32, #tpu.memory_space<vmem>>) attributes {dimension_semantics = [#tpu.dimension_semantics<parallel>, #tpu.dimension_semantics<parallel>, #tpu.dimension_semantics<arbitrary>], iteration_bounds = array<i64: 2, 2, 1>, scalar_prefetch = 0 : i64, scratch_operands = 0 : i64, tpu.core_type = #tpu.core_type<tc>, window_params = [{transform_indices = @transform_0, window_bounds = array<i64: 1, 3, 8, 16>}, {transform_indices = @transform_1, window_bounds = array<i64: 1, 8, 16>}, {transform_indices = @transform_2, window_bounds = array<i64: 1, 1, 4, 16>}]} {
    %c0 = arith.constant 0 : index
    %c0_0 = arith.constant 0 : index
    %c0_1 = arith.constant 0 : index
    %c0_2 = arith.constant 0 : index
    %0 = vector.load %arg3[%c0, %c0_0, %c0_1, %c0_2] : memref<1x3x8x16xf32, #tpu.memory_space<vmem>>, vector<1x1x8x16xf32>
    %1 = vector.shape_cast %0 : vector<1x1x8x16xf32> to vector<8x16xf32>
    %c0_3 = arith.constant 0 : index
    %c1 = arith.constant 1 : index
    %c0_4 = arith.constant 0 : index
    %c0_5 = arith.constant 0 : index
    %2 = vector.load %arg3[%c0_3, %c1, %c0_4, %c0_5] : memref<1x3x8x16xf32, #tpu.memory_space<vmem>>, vector<1x1x8x16xf32>
    %3 = vector.shape_cast %2 : vector<1x1x8x16xf32> to vector<8x16xf32>
    %c0_6 = arith.constant 0 : index
    %c2 = arith.constant 2 : index
    %c0_7 = arith.constant 0 : index
    %c0_8 = arith.constant 0 : index
    %4 = vector.load %arg3[%c0_6, %c2, %c0_7, %c0_8] : memref<1x3x8x16xf32, #tpu.memory_space<vmem>>, vector<1x1x8x16xf32>
    %5 = vector.shape_cast %4 : vector<1x1x8x16xf32> to vector<8x16xf32>
    %6 = arith.cmpf ogt, %3, %1 : vector<8x16xf32>
    %7 = arith.cmpf oge, %3, %5 : vector<8x16xf32>
    %8 = arith.andi %6, %7 : vector<8x16xi1>
    %9 = arith.maximumf %1, %3 : vector<8x16xf32>
    %10 = arith.cmpf ogt, %5, %9 : vector<8x16xf32>
    %c0_9 = arith.constant 0 : index
    %c0_10 = arith.constant 0 : index
    %c0_11 = arith.constant 0 : index
    %11 = vector.load %arg4[%c0_9, %c0_10, %c0_11] : memref<1x8x16xi32, #tpu.memory_space<vmem>>, vector<1x8x16xi32>
    %12 = vector.shape_cast %11 : vector<1x8x16xi32> to vector<8x16xi32>
    %c1_i32 = arith.constant 1 : i32
    %13 = vector.broadcast %c1_i32 : i32 to vector<8x16xi32>
    %14 = arith.cmpi eq, %12, %13 : vector<8x16xi32>
    %c2_i32 = arith.constant 2 : i32
    %15 = vector.broadcast %c2_i32 : i32 to vector<8x16xi32>
    %16 = arith.cmpi eq, %12, %15 : vector<8x16xi32>
    %17 = arith.andi %8, %14 : vector<8x16xi1>
    %18 = arith.extui %17 : vector<8x16xi1> to vector<8x16xi32>
    %19 = arith.sitofp %18 : vector<8x16xi32> to vector<8x16xf32>
    %cst = arith.constant dense<0.000000e+00> : vector<16xf32>
    %20 = vector.multi_reduction <add>, %19, %cst [0] : vector<8x16xf32> to vector<16xf32>
    %21 = vector.shape_cast %20 : vector<16xf32> to vector<1x16xf32>
    %22 = arith.ori %8, %14 : vector<8x16xi1>
    %23 = arith.extui %22 : vector<8x16xi1> to vector<8x16xi32>
    %24 = arith.sitofp %23 : vector<8x16xi32> to vector<8x16xf32>
    %cst_12 = arith.constant dense<0.000000e+00> : vector<16xf32>
    %25 = vector.multi_reduction <add>, %24, %cst_12 [0] : vector<8x16xf32> to vector<16xf32>
    %26 = vector.shape_cast %25 : vector<16xf32> to vector<1x16xf32>
    %27 = arith.andi %10, %16 : vector<8x16xi1>
    %28 = arith.extui %27 : vector<8x16xi1> to vector<8x16xi32>
    %29 = arith.sitofp %28 : vector<8x16xi32> to vector<8x16xf32>
    %cst_13 = arith.constant dense<0.000000e+00> : vector<16xf32>
    %30 = vector.multi_reduction <add>, %29, %cst_13 [0] : vector<8x16xf32> to vector<16xf32>
    %31 = vector.shape_cast %30 : vector<16xf32> to vector<1x16xf32>
    %32 = arith.ori %10, %16 : vector<8x16xi1>
    %33 = arith.extui %32 : vector<8x16xi1> to vector<8x16xi32>
    %34 = arith.sitofp %33 : vector<8x16xi32> to vector<8x16xf32>
    %cst_14 = arith.constant dense<0.000000e+00> : vector<16xf32>
    %35 = vector.multi_reduction <add>, %34, %cst_14 [0] : vector<8x16xf32> to vector<16xf32>
    %36 = vector.shape_cast %35 : vector<16xf32> to vector<1x16xf32>
    %37 = tpu.concatenate %21, %26, %31, %36 in 0 : vector<1x16xf32>, vector<1x16xf32>, vector<1x16xf32>, vector<1x16xf32> -> vector<4x16xf32>
    %c0_i32 = arith.constant 0 : i32
    %38 = arith.cmpi eq, %arg2, %c0_i32 : i32
    %39 = arith.extui %38 : i1 to i32
    %c0_i32_15 = arith.constant 0 : i32
    %40 = arith.cmpi ne, %39, %c0_i32_15 : i32
    scf.if %40 {
      %cst_24 = arith.constant 0.000000e+00 : f32
      %47 = vector.broadcast %cst_24 : f32 to vector<4x16xf32>
      %c0_25 = arith.constant 0 : index
      %c0_26 = arith.constant 0 : index
      %c0_27 = arith.constant 0 : index
      %c0_28 = arith.constant 0 : index
      %48 = vector.load %arg5[%c0_25, %c0_26, %c0_27, %c0_28] : memref<1x1x4x16xf32, #tpu.memory_space<vmem>>, vector<1x1x4x16xf32>
      %49 = vector.shape_cast %48 : vector<1x1x4x16xf32> to vector<4x16xf32>
      %50 = vector.shape_cast %47 : vector<4x16xf32> to vector<1x1x4x16xf32>
      tpu.vector_store %arg5[%c0_25, %c0_26, %c0_27, %c0_28], %50 {strides = array<i32>} : memref<1x1x4x16xf32, #tpu.memory_space<vmem>>, vector<1x1x4x16xf32>,
    } else {
    }
    %c0_16 = arith.constant 0 : index
    %c0_17 = arith.constant 0 : index
    %c0_18 = arith.constant 0 : index
    %c0_19 = arith.constant 0 : index
    %41 = vector.load %arg5[%c0_16, %c0_17, %c0_18, %c0_19] : memref<1x1x4x16xf32, #tpu.memory_space<vmem>>, vector<1x1x4x16xf32>
    %42 = vector.shape_cast %41 : vector<1x1x4x16xf32> to vector<4x16xf32>
    %43 = arith.addf %42, %37 : vector<4x16xf32>
    %c0_20 = arith.constant 0 : index
    %c0_21 = arith.constant 0 : index
    %c0_22 = arith.constant 0 : index
    %c0_23 = arith.constant 0 : index
    %44 = vector.load %arg5[%c0_20, %c0_21, %c0_22, %c0_23] : memref<1x1x4x16xf32, #tpu.memory_space<vmem>>, vector<1x1x4x16xf32>
    %45 = vector.shape_cast %44 : vector<1x1x4x16xf32> to vector<4x16xf32>
    %46 = vector.shape_cast %43 : vector<4x16xf32> to vector<1x1x4x16xf32>
    tpu.vector_store %arg5[%c0_20, %c0_21, %c0_22, %c0_23], %46 {strides = array<i32>} : memref<1x1x4x16xf32, #tpu.memory_space<vmem>>, vector<1x1x4x16xf32>,
    return
  }
  func.func @transform_0(%arg0: i32, %arg1: i32, %arg2: i32) -> (i32, i32, i32, i32) {
    %c1_i32 = arith.constant 1 : i32
    %0 = arith.muli %arg1, %c1_i32 : i32
    %1 = arith.addi %0, %arg2 : i32
    %c0_i32 = arith.constant 0 : i32
    %c0_i32_0 = arith.constant 0 : i32
    %c0_i32_1 = arith.constant 0 : i32
    return %arg0, %c0_i32, %1, %c0_i32_0 : i32, i32, i32, i32
  }
  func.func @transform_1(%arg0: i32, %arg1: i32, %arg2: i32) -> (i32, i32, i32) {
    %c1_i32 = arith.constant 1 : i32
    %0 = arith.muli %arg1, %c1_i32 : i32
    %1 = arith.addi %0, %arg2 : i32
    %c0_i32 = arith.constant 0 : i32
    %c0_i32_0 = arith.constant 0 : i32
    return %arg0, %1, %c0_i32 : i32, i32, i32
  }
  func.func @transform_2(%arg0: i32, %arg1: i32, %arg2: i32) -> (i32, i32, i32, i32) {
    %c0_i32 = arith.constant 0 : i32
    %c0_i32_0 = arith.constant 0 : i32
    %c0_i32_1 = arith.constant 0 : i32
    return %arg0, %arg1, %c0_i32, %c0_i32_0 : i32, i32, i32, i32
  }
}

</mosaic_0001>

<bundles_post_ra>
// kernel: iou_pallas.1
= control target key start
LH: loop header
LB: loop body
LE: loop exit
PB: predicated region body
PF: predicated region fallthrough
CT: control target
= control target key end

     0   :  { %s889_s0 = inlined_call_operand.hbm [shape: f32[2,3,16,16], index: 0, kind: input, shape index: {}]   ;;  %s890_s1 = inlined_call_operand.hbm [shape: s32[2,16,16], index: 1, kind: input, shape index: {}]   ;;  %s891_s2 = inlined_call_operand.vmem [shape: f32[2,2,4,16], index: 2, kind: output, shape index: {}]  }
   0x1   :  { %894 = sst [smem:[#allocation9_spill]] %s889_s0 }
   0x2   :  { %7 = vsyncpa [#allocation3], 0 }
   0x3   :  { %9 = vsyncpa [#allocation3 + $0x1], 0 }
   0x4   :  { %10 = vsyncpa [#allocation5], 0 }
   0x5   :  { %12 = vsyncpa [#allocation5 + $0x1], 0  ;;  %s693_s9 = smov 0   ;;  %s695_s10 = smov 0  }
   0x6   :  { %s697_s11 = smov 0   ;;  %s699_s12 = smov 0  }
   0x7   :  { %s701_s13 = smov 0   ;;  %s703_s14 = smov 0  }
   0x8   :  { %s705_s15 = smov 0   ;;  %s707_s16 = smov 0  }
   0x9 LB: > { %s437_s17 = sadd.s32 4294967295, %s670_s16   ;;  %s33_s18 = sadd.s32 1, %s662_s14  ;;  %s670_s16 = sphi %s707_s16, %s18_s16   ;;  %s666_s15 = sphi %s705_s15, %s909_s15   ;;  %s662_s14 = sphi %s703_s14, %s908_s14   ;;  %s658_s13 = sphi %s701_s13, %s907_s13   ;;  %s654_s12 = sphi %s699_s12, %s906_s12   ;;  %s650_s11 = sphi %s697_s11, %s905_s11   ;;  %s646_s10 = sphi %s695_s10, %s904_s10   ;;  %s642_s9 = sphi %s693_s9, %s903_s9  }
   0xa   : > { %p35_p0 = scmp.ge.s32.totalorder %s33_s18, 2  ;;  %s37_s19 = sadd.s32 1, %s666_s15 }
   0xb   : > { %s48_s20 = sadd.s32 1, %s650_s11  ;;  %p55_p1 = scmp.ne.s32.totalorder %s650_s11, %s646_s10 }
   0xc   : > { %s911_s18 = smov (%p35_p0, %s33_s18), 0  ;;  %s913_s19 = smov (!%p35_p0, %s37_s19), %s666_s15 }
   0xd   : > { %s44_s21 = ssub.s32 %s662_s14, %s911_s18  ;;  %p56_p2 = scmp.eq.s32.totalorder %s670_s16, 0 }
   0xe   : > { %p39_p3 = scmp.ge.s32.totalorder %s913_s19, 2  ;;  %p61_p4 = scmp.ne.s32.totalorder %s646_s10, %s642_s9 }
   0xf   : > { %p57_p5 = por %p56_p2, %p55_p1  ;;  %p62_p6 = scmp.eq.s32.totalorder %s437_s17, 0 }
  0x10   : > { %s915_s19 = smov (%p39_p3, %s913_s19), 0  ;;  %p471_p8 = scmp.lt.s32.totalorder %s670_s16, 4 }
  0x11   : > { %895 = sst [smem:[#allocation8_spill]] %s915_s19  ;;  %p746_p7 = por %p62_p6, %p61_p4 }
  0x12   : > { %s43_s23 = ssub.s32 %s666_s15, %s915_s19  ;;  %s754_s25 = sand.u32 1, %s650_s11  }
  0x13   : > { %s896_s22 = scalar_select %p746_p7, 1, 0 }
  0x14   : > { %s45_s24 = sor.u32 %s44_s21, %s43_s23  ;;  %s457_s26 = smul.u32 24, %s754_s25 }
  0x15   : > { %p46_p9 = scmp.eq.s32.totalorder %s45_s24, 0  ;;  %p757_p10 = pnand %p471_p8, %p57_p5 }
  0x16   : > { %s458_s29 = smul.u32 6, %s666_s15  ;;  %s147_s30 = scalar_lea.vmem [#allocation2], %s457_s26 }
  0x17   : > { %s762_s28 = scalar_select %p46_p9, %s650_s11, %s48_s20  }
  0x18   : > { %s156_s3 = sshll.u32 %s147_s30, 4  ;;  %s153_s4 = sadd.s32 %s662_s14, %s458_s29  ;;  %s766_s3 = int_to_ptr.vmem [resolvable:$true] %s156_s3 }
  0x19   : > { %s441_s5 = sshll.u32 %s153_s4, 7  ;;  %s898_s0 = sld [smem:[#allocation9_spill]] }
  0x1a   : > { %s144_s9 = scalar_lea.sflag [#allocation3], %s754_s25  ;;  %p542_p13 = pneg %p757_p10 }
  0x1f   : > { %s771_s8 = scalar_lea.hbm %s898_s0, %s441_s5  ;;  %s545_s23 = scalar_lea.hbm %s898_s0, 1536 }
  0x20   : > { %s540_s17 = scalar_lea.hbm %s771_s8, 384  ;;  %p546_p2 = scmp.lt.u32.totalorder %s771_s8, %s898_s0 }
  0x21   : > { %p541_p12 = scmp.ne.s32.totalorder %s771_s8, %s540_s17  ;;  %p547_p3 = scmp.lt.u32.totalorder %s545_s23, %s540_s17 }
  0x22   : > { %p549_p5 = scmp.lt.u32.totalorder %s540_s17, %s771_s8 }
  0x23   : > { %p543_p0 = pnand %p542_p13, %p541_p12  ;;  %p548_p4 = por %p547_p3, %p546_p2 }
  0x25   : > { %p544_p1 = pneg %p543_p0  ;;  %p550_p6 = por %p549_p5, %p548_p4 }
  0x27   : > { %p551_p8 = pnand %p550_p6, %p544_p1 }
  0x29   : > { %554 = shalt.err (!%p551_p8)
}
  0x2a   : > { %s555_s29 = scalar_lea.vmem %s766_s3, 384  ;;  %s672_s30 = smov [#allocation2]  }
  0x2b   : > { %p556_p9 = scmp.ne.s32.totalorder %s766_s3, %s555_s29  ;;  %s560_s4 = sshll.u32 %s672_s30, 4  ;;  %s561_s4 = int_to_ptr.vmem [resolvable:$false] %s560_s4 }
  0x2c   : > { %s562_s5 = scalar_lea.vmem %s561_s4, 768  ;;  %p563_p11 = scmp.lt.s32.totalorder %s766_s3, %s561_s4 }
  0x2d   : > { %p558_p12 = pnand %p556_p9, %p542_p13  ;;  %p564_p2 = scmp.lt.s32.totalorder %s562_s5, %s555_s29 }
  0x2f   : > { %p559_p0 = pneg %p558_p12  ;;  %p565_p3 = por %p564_p2, %p563_p11 }
  0x31   : > { %p566_p4 = pnand %p565_p3, %p559_p0 }
  0x33   : > { %569 = shalt.err (!%p566_p4)
}
  0x34   : > { %s673_s6 = smov 256   ;;  %s674_s7 = smov 128  }
  0x35   : > { %s675_s17 = smov 8   ;;  %p185_p11 = scmp.lt.s32.totalorder %s670_s16, 5 }
  0x36   : > { %467 = dma.hbm_to_vmem [thread:$0]  (!%p757_p10), %s771_s8, 384, %s766_s3, %s144_s9, %s673_s6, %s674_s7, %s675_s17  }
  0x37   : > { %s442_s20 = sshll.u32 %s754_s25, 3  ;;  %s443_s21 = sshll.u32 %s666_s15, 1 }
  0x38   : > { %p899_p1 = scmp.ge.s32.totalorder %s670_s16, 1  ;;  %s176_s24 = sadd.s32 %s662_s14, %s443_s21 }
  0x39   : > { %s170_s26 = scalar_lea.vmem [#allocation4], %s442_s20  ;;  %s444_s30 = sshll.u32 %s176_s24, 7 }
  0x3a   : > { %p807_p5 = pnand %p899_p1, %p185_p11  ;;  %s180_s29 = sshll.u32 %s170_s26, 4  ;;  %s812_s29 = int_to_ptr.vmem [resolvable:$true] %s180_s29 }
  0x3b   : > { %s178_s0 = scalar_lea.hbm %s890_s1, %s444_s30  ;;  %s167_s19 = scalar_lea.sflag [#allocation5], %s754_s25 }
  0x3c   : > { %s570_s3 = scalar_lea.hbm %s178_s0, 128  ;;  %s575_s6 = scalar_lea.hbm %s890_s1, 512 }
  0x3d   : > { %p571_p6 = scmp.ne.s32.totalorder %s178_s0, %s570_s3  ;;  %p576_p12 = scmp.lt.u32.totalorder %s178_s0, %s890_s1 }
  0x3e   : > { %p577_p0 = scmp.lt.u32.totalorder %s575_s6, %s570_s3  ;;  %p579_p3 = scmp.lt.u32.totalorder %s570_s3, %s178_s0 }
  0x3f   : > { %p573_p8 = pnand %p571_p6, %p542_p13 }
  0x40   : > { %p578_p2 = por %p577_p0, %p576_p12 }
  0x41   : > { %p574_p9 = pneg %p573_p8 }
  0x42   : > { %p580_p4 = por %p579_p3, %p578_p2 }
  0x44   : > { %p581_p11 = pnand %p580_p4, %p574_p9 }
  0x46   : > { %584 = shalt.err (!%p581_p11)
}
  0x47   : > { %s585_s25 = scalar_lea.vmem %s812_s29, 128  ;;  %s676_s20 = smov [#allocation4]  }
  0x48   : > { %p586_p1 = scmp.ne.s32.totalorder %s812_s29, %s585_s25  ;;  %s590_s21 = sshll.u32 %s676_s20, 4  ;;  %s591_s21 = int_to_ptr.vmem [resolvable:$false] %s590_s21 }
  0x49   : > { %s592_s24 = scalar_lea.vmem %s591_s21, 256  ;;  %p593_p7 = scmp.lt.s32.totalorder %s812_s29, %s591_s21 }
  0x4a   : > { %p588_p6 = pnand %p586_p1, %p542_p13  ;;  %p594_p12 = scmp.lt.s32.totalorder %s592_s24, %s585_s25 }
  0x4c   : > { %p589_p8 = pneg %p588_p6  ;;  %p595_p0 = por %p594_p12, %p593_p7 }
  0x4e   : > { %p596_p2 = pnand %p595_p0, %p589_p8 }
  0x50   : > { %599 = shalt.err (!%p596_p2)
}
  0x51   : > { %470 = dma.hbm_to_vmem [thread:$0]  (!%p757_p10), %s178_s0, 128, %s812_s29, %s167_s19  }
  0x52   : > { %189 = sbr.rel (%p807_p5) target bundleno = 119 (0x77), region = 28  ;;  %s191_s26 = sand.u32 (!%p807_p5), 1, %s646_s10  }
  0x53   : > { %s459_s30 = smul.u32 (!%p807_p5), 24, %s191_s26  ;;  %s192_s4 = scalar_lea.sflag (!%p807_p5), [#allocation3], %s191_s26 }
  0x54   : > { %p901_p13 = scmp.ne.s32.totalorder (!%p807_p5), %s896_s22, 0 }
  0x55   : > { %s195_s5 = scalar_lea.vmem (!%p807_p5), [#allocation2], %s459_s30 }
  0x59   : > { %633 = dma.done.wait (%p901_p13), %s192_s4, 384  }
  0x5a   : > { %635 = vsyncadd (%p901_p13), %s192_s4, 4294966912  ;;  %s446_s3 = sshll.u32 %s191_s26, 3  ;;  %s201_s8 = scalar_lea.sflag [#allocation5], %s191_s26 }
  0x5b   : > { %s204_s27 = scalar_lea.vmem [#allocation4], %s446_s3 }
  0x5c   : > { %637 = dma.done.wait (%p901_p13), %s201_s8, 128  }
  0x5d   : > { %639 = vsyncadd (%p901_p13), %s201_s8, 4294967168  ;;  %p235_p7 = scmp.lt.s32.totalorder %s658_s13, 1  ;;  %p237_p10 = scmp.lt.s32.totalorder %s654_s12, 1  ;;  %vm307_vm0 = vcmask 125952   ;;  %v243_v0 = vld [vmem:[%s195_s5] sm:$0xff]  ;;  %v449_v1 = vld [vmem:[%s195_s5 + $0x8] sm:$0xff] }
  0x5e   : > { %v450_v2 = vld [vmem:[%s195_s5 + $0x10] sm:$0xff]  ;;  %vm248_vm1 = vcmp.gt.f32.partialorder %v449_v1, %v243_v0  ;;  %v251_v3 = vmax.f32 %v243_v0, %v449_v1  ;;  %v677_v5 = vmov 0.0   ;;  %vm259_vm6 = vcmask 130048  }
  0x5f   : > { %s917_s13 = smov (!%p235_p7, %s658_s13), 1  ;;  %s919_s12 = smov (!%p237_p10, %s654_s12), 1  ;;  %vm249_vm2 = vcmp.ge.f32.partialorder %v449_v1, %v450_v2  ;;  %v253_v4 = vld [vmem:[%s204_s27] sm:$0xff]  ;;  %vm297_vm12 = vcmask 1040384   ;;  %vm299_vm13 = vcmask 1041408   ;;  %vm301_vm14 = vcmask 1042432  }
  0x60   : > { %s447_s0 = sshll.u32 %s917_s13, 1  ;;  %vm250_vm3 = vmand %vm248_vm1, %vm249_vm2  ;;  %vm254_vm4 = vcmp.eq.s32.totalorder %v253_v4, 1  ;;  %vm255_vm5 = vcmp.eq.s32.totalorder %v253_v4, 2  ;;  %vm252_vm7 = vcmp.gt.f32.partialorder %v450_v2, %v251_v3 }
  0x61   : > { %s240_s19 = sadd.s32 %s447_s0, %s919_s12  ;;  %vm256_vm8 = vmand %vm250_vm3, %vm254_vm4 }
  0x62   : > { %s448_s23 = sshll.u32 %s240_s19, 2  ;;  %v451_v6 = vsel %vm256_vm8, 1.0, %v677_v5  ;;  %vm267_vm9 = vmor %vm250_vm3, %vm254_vm4 }
  0x63   : > { %s854_s6 = scalar_lea.vmem %s891_s2, %s448_s23  ;;  %v260_v7 = vsel %vm259_vm6, %v451_v6, 0.0  ;;  %v452_v8 = vsel %vm267_vm9, 1.0, %v677_v5  ;;  %vm277_vm10 = vmand %vm252_vm7, %vm255_vm5 }
  0x64   : > { %308 = vst.msk [vmem:[%s854_s6] sm:$0xf] %vm307_vm0, %v677_v5  ;;  %v261_v9 = vrot.slane %v260_v7, 4  ;;  %v270_v10 = vsel %vm259_vm6, %v452_v8, 0.0  ;;  %v453_v11 = vsel %vm277_vm10, 1.0, %v677_v5  ;;  %vm287_vm11 = vmor %vm252_vm7, %vm255_vm5 }
  0x65   : > { %v271_v12 = vrot.slane %v270_v10, 4  ;;  %v280_v13 = vsel %vm259_vm6, %v453_v11, 0.0  ;;  %v454_v14 = vsel %vm287_vm11, 1.0, %v677_v5 }
  0x66   : > { %v262_v15 = vadd.f32 %v261_v9, %v260_v7  ;;  %v281_v16 = vrot.slane %v280_v13, 4  ;;  %v290_v17 = vsel %vm259_vm6, %v454_v14, 0.0 }
  0x67   : > { %v272_v18 = vadd.f32 %v271_v12, %v270_v10  ;;  %v291_v19 = vrot.slane %v290_v17, 4 }
  0x68   : > { %v263_v20 = vrot.slane %v262_v15, 2  ;;  %v282_v21 = vadd.f32 %v281_v16, %v280_v13 }
  0x69   : > { %v273_v22 = vrot.slane %v272_v18, 2  ;;  %v292_v23 = vadd.f32 %v291_v19, %v290_v17 }
  0x6a   : > { %v264_v24 = vadd.f32 %v263_v20, %v262_v15  ;;  %v283_v25 = vrot.slane %v282_v21, 2 }
  0x6b   : > { %v274_v26 = vadd.f32 %v273_v22, %v272_v18  ;;  %v293_v27 = vrot.slane %v292_v23, 2  ;;  %v309_v39 = vld [vmem:[%s854_s6] sm:$0xf] }
  0x6c   : > { %v265_v28 = vrot.slane %v264_v24, 1  ;;  %v284_v29 = vadd.f32 %v283_v25, %v282_v21 }
  0x6d   : > { %v275_v30 = vrot.slane %v274_v26, 1  ;;  %v294_v31 = vadd.f32 %v293_v27, %v292_v23 }
  0x6e   : > { %v266_v32 = vadd.f32 %v265_v28, %v264_v24  ;;  %v285_v33 = vrot.slane %v284_v29, 1 }
  0x6f   : > { %v276_v34 = vadd.f32 %v275_v30, %v274_v26  ;;  %v295_v35 = vrot.slane %v294_v31, 1 }
  0x70   : > { %v286_v36 = vadd.f32 %v285_v33, %v284_v29 }
  0x71   : > { %v296_v37 = vadd.f32 %v295_v35, %v294_v31  ;;  %v298_v38 = vsel %vm297_vm12, %v266_v32, %v276_v34 }
  0x72   : > { %v300_v40 = vsel %vm299_vm13, %v298_v38, %v286_v36 }
  0x73   : > { %v302_v41 = vsel %vm301_vm14, %v300_v40, %v296_v37 }
  0x74   : > { %v310_v42 = vadd.f32 %v309_v39, %v302_v41 }
  0x76   : > { %312 = vst.msk [vmem:[%s854_s6] sm:$0xf] %vm307_vm0, %v310_v42 }
  0x77 PF: > { %s18_s16 = sadd.s32 1, %s670_s16   ;;  %s902_s22 = sld [smem:[#allocation8_spill]] }
  0x78   : > { %p15_p5 = scmp.ge.s32.totalorder %s18_s16, 6   ;;  %s903_s9 = smov %s646_s10 }
  0x79   : > { %s904_s10 = smov %s650_s11  ;;  %s905_s11 = smov %s762_s28 }
  0x7a   : > { %s906_s12 = smov %s662_s14  ;;  %s907_s13 = smov %s666_s15 }
  0x7b   : > { %s908_s14 = smov %s911_s18  ;;  %17 = sbr.rel (!%p15_p5) target bundleno = 9 (0x9), region = 87 }
  0x7d   : > { %s909_s15 = smov %s902_s22 }
  0x82   :  { %340 = vsyncpa [#allocation3], 1 }
  0x83   :  { %342 = vsyncpa [#allocation3 + $0x1], 1 }
  0x84   :  { %343 = vsyncpa [#allocation5], 1 }
  0x85   :  { %345 = vsyncpa [#allocation5 + $0x1], 1 }

</bundles_post_ra>
